<compile_context>
chip_gen: v6e
topology: v6e:2x2x1
jax: 0.10.0
libtpu: 0.0.40
codegen_flags: <defaults>
</compile_context>

<pallas_src>
import functools

import jax
import jax.numpy as jnp
from jax.experimental import pallas as pl
from jax.experimental.pallas import tpu as pltpu

_LANE = 128      # feature dims padded to multiples of this (lane width)
_SUBLANE = 8     # batch padded to multiples of this (sublane width)

# Resident bf16 parameter budget per pallas_call.  Chosen so weights + biases
# + double-buffered activation tiles + scratch stay well inside v7x's 64 MiB
# per-TensorCore VMEM (v5e/v6e have 128 MiB and are also fine).
_WEIGHT_VMEM_BUDGET = 40 << 20


def _round_up(v, m):
    return ((v + m - 1) // m) * m


def _choose_tm(m, tm_cap=256):
    """Pick the batch tile and padded batch.

    Minimise padded-row waste, then maximise the tile (bigger tiles fill the
    256-wide MXU on v6e/v7x and amortise the per-grid-step overhead), and keep
    >=2 grid steps when the batch allows it so v7x's two TensorCores both get
    work.  On v5e (128-wide MXU) a smaller tm_cap (128) is also fine.
    """
    m8 = _round_up(max(m, 1), _SUBLANE)
    cap = min(_round_up(tm_cap, _SUBLANE), m8)
    if m8 >= 2 * _SUBLANE:  # leave >=2 grid steps for v7x's 2 TensorCores
        cap = min(cap, (m8 // 2) // _SUBLANE * _SUBLANE)
    cap = max(cap, _SUBLANE)

    best_tm, best_key = _SUBLANE, None
    for t in range(_SUBLANE, cap + 1, _SUBLANE):
        m_pad = _round_up(m8, t)
        steps = m_pad // t
        # cost model: padded rows actually computed + ~16 rows-equivalent of
        # fixed overhead per grid step; prefer larger tiles on ties.
        key = (m_pad + 16 * steps, -t)
        if best_key is None or key < best_key:
            best_key, best_tm = key, t
    return best_tm, _round_up(m8, best_tm)


# ---------------------------------------------------------------------------
# Parameter init mirroring nn.Linear's U(-1/sqrt(fan_in), 1/sqrt(fan_in)).
# Weights are stored as [in_features, out_features] (== PyTorch weight.T).
# ---------------------------------------------------------------------------
def init_ffnn_params(key, input_dim, hidden_dim, num_layers, output_dim=None,
                     dtype=jnp.float32):
    layer_dims = [(input_dim, hidden_dim)] + [(hidden_dim, hidden_dim)] * (num_layers - 1)
    params = []
    for (i, o) in layer_dims:
        key, kw, kb = jax.random.split(key, 3)
        bound = 1.0 / float(i) ** 0.5
        w = jax.random.uniform(kw, (i, o), dtype, -bound, bound)
        b = jax.random.uniform(kb, (o,), dtype, -bound, bound)
        params.append((w, b))
    proj = None
    if output_dim is not None:
        key, kw, kb = jax.random.split(key, 3)
        bound = 1.0 / float(hidden_dim) ** 0.5
        proj = (jax.random.uniform(kw, (hidden_dim, output_dim), dtype, -bound, bound),
                jax.random.uniform(kb, (output_dim,), dtype, -bound, bound))
    return params, proj


# ---------------------------------------------------------------------------
# One-time parameter preparation: pad + cast ONCE (not per forward call).
# ---------------------------------------------------------------------------
def prepare_ffnn_params(layer_params, projection_params=None,
                        weight_dtype=jnp.bfloat16):
    """Pad weights to lane-dense (multiples of 128) shapes and cast to bf16;
    pack all (zero-padded, f32) biases into one (num_linears, max_n_pad)
    matrix.  Zero padding is mathematically inert (padded rows/cols/biases
    are zero)."""
    linears = [(w, b, True) for (w, b) in layer_params]
    if projection_params is not None:
        linears.append((projection_params[0], projection_params[1], False))
    if not linears:
        return None          # identity network (no layers, no projection)

    weights, dims, biases = [], [], []
    prev_out = None
    for (w, b, relu) in linears:
        k, n = w.shape
        if prev_out is not None and k != prev_out:
            raise ValueError("layer input dim does not match previous output dim")
        prev_out = n
        k_pad, n_pad = _round_up(k, _LANE), _round_up(n, _LANE)
        weights.append(jnp.pad(w, ((0, k_pad - k), (0, n_pad - n))).astype(weight_dtype))
        biases.append(jnp.asarray(b, jnp.float32))
        dims.append((k_pad, n_pad, relu, n))

    max_n_pad = max(d[1] for d in dims)
    bias_mat = jnp.stack([jnp.pad(b, (0, max_n_pad - b.shape[0])) for b in biases])

    return {
        "weights": weights,          # list of bf16 (k_pad, n_pad) arrays
        "bias_mat": bias_mat,        # f32 (num_linears, max_n_pad)
        "dims": tuple(dims),         # per linear: (k_pad, n_pad, relu, n_true)
        "d_in": linears[0][0].shape[0],
    }


# ---------------------------------------------------------------------------
# Fused kernel body for one chunk of consecutive linears.
# refs = (x, w_0..w_{L-1}, bias_mat, out, h_scratch)
# ---------------------------------------------------------------------------
def _ffnn_chunk_kernel(*refs, layer_meta):
    n = len(layer_meta)
    x_ref = refs[0]
    w_refs = refs[1:1 + n]
    bias_ref = refs[1 + n]
    out_ref = refs[2 + n]
    h_ref = refs[3 + n]           # explicit f32 VMEM scratch for activations

    for li, (k_pad, n_pad, relu, brow) in enumerate(layer_meta):
        h = x_ref[...] if li == 0 else h_ref[:, :k_pad]
        # bf16 operands on the MXU, f32 accumulation.
        y = jnp.dot(h.astype(jnp.bfloat16), w_refs[li][...],
                    preferred_element_type=jnp.float32)
        y = y + bias_ref[brow:brow + 1, :n_pad]          # f32 bias-add
        if relu:
            y = jnp.maximum(y, 0.0)
        # TODO(synk): training-mode dropout (PyTorch RNG) not reproduced;
        # eval-mode identity is used.
        if li == n - 1:
            out_ref[...] = y.astype(out_ref.dtype)
        else:
            h_ref[:, :n_pad] = y


# ---------------------------------------------------------------------------
# One fused pallas_call for a chunk of layers (all weights VMEM-resident).
# ---------------------------------------------------------------------------
def _run_chunk(h, prepared, layer_ids, tm, m_pad, use_buffered):
    weights = [prepared["weights"][i] for i in layer_ids]
    bias_mat = prepared["bias_mat"]
    dims = prepared["dims"]
    metas = tuple((dims[i][0], dims[i][1], dims[i][2], i) for i in layer_ids)

    k0_pad = metas[0][0]
    last_n_pad = metas[-1][1]
    scratch_w = max([_LANE] + [mt[1] for mt in metas[:-1]])

    param_bytes = (sum(w.size * w.dtype.itemsize for w in weights)
                   + bias_mat.size * bias_mat.dtype.itemsize)
    flops = sum(2 * m_pad * k * n + m_pad * n for (k, n, _, _) in metas)
    io_bytes = (m_pad * (k0_pad + last_n_pad)) * 4 + param_bytes

    kernel = functools.partial(_ffnn_chunk_kernel, layer_meta=metas)
    grid = (m_pad // tm,)

    def call(buffered):
        resident_kwargs = {"pipeline_mode": pl.Buffered(1)} if buffered else {}
        n_buf = 1 if buffered else 2
        in_specs = [pl.BlockSpec((tm, k0_pad), lambda i: (i, 0))]
        for w in weights:
            in_specs.append(pl.BlockSpec(w.shape, lambda i: (0, 0), **resident_kwargs))
        in_specs.append(pl.BlockSpec(bias_mat.shape, lambda i: (0, 0), **resident_kwargs))

        need = (param_bytes * n_buf
                + 2 * tm * k0_pad * 4          # double-buffered x tiles
                + 2 * tm * last_n_pad * 4      # double-buffered out tiles
                + tm * scratch_w * 4)          # activation scratch
        vmem_limit = int(min(max(need * 1.25 + (4 << 20), 32 << 20), 100 << 20))

        return pl.pallas_call(
            kernel,
            out_shape=jax.ShapeDtypeStruct((m_pad, last_n_pad), h.dtype),
            grid=grid,
            in_specs=in_specs,
            out_specs=pl.BlockSpec((tm, last_n_pad), lambda i: (i, 0)),
            scratch_shapes=[pltpu.VMEM((tm, scratch_w), jnp.float32)],
            compiler_params=pltpu.CompilerParams(
                dimension_semantics=("parallel",),     # v7x: split batch over 2 TCs
                vmem_limit_bytes=vmem_limit),
            cost_estimate=pl.CostEstimate(
                flops=flops, transcendentals=0, bytes_accessed=io_bytes),
        )(h, *weights, bias_mat)

    if use_buffered:
        try:
            return call(True), True
        except Exception:
            # pipeline_mode=pl.Buffered(1) not supported by this JAX build;
            # fall back to default (double-buffered) resident specs.
            pass
    return call(False), False


# ---------------------------------------------------------------------------
# Forward pass over prepared (pre-padded, pre-cast) parameters.
# ---------------------------------------------------------------------------
def ffnn_forward(x, prepared, *, tm_cap=256, weight_budget_bytes=_WEIGHT_VMEM_BUDGET):
    if prepared is None:       # num_layers == 0 and no projection -> identity
        return x

    m, d_in = x.shape
    if d_in != prepared["d_in"]:
        raise ValueError("input feature dim does not match prepared parameters")
    dims = prepared["dims"]
    d_in_pad = dims[0][0]
    d_out = dims[-1][3]

    tm, m_pad = _choose_tm(m, tm_cap)
    x_p = x.astype(jnp.float32)
    if (m_pad, d_in_pad) != (m, d_in):
        x_p = jnp.pad(x_p, ((0, m_pad - m), (0, d_in_pad - d_in)))

    # Chunk layers so resident bf16 weights stay under the VMEM budget
    # (guard for v7x's 64 MiB per-TensorCore VMEM).
    chunks, cur, cur_bytes = [], [], 0
    for li, w in enumerate(prepared["weights"]):
        wb = w.size * w.dtype.itemsize
        if cur and cur_bytes + wb > weight_budget_bytes:
            chunks.append(cur)
            cur, cur_bytes = [], 0
        cur.append(li)
        cur_bytes += wb
    chunks.append(cur)
    # TODO(synk): a single layer whose weight alone exceeds the budget would
    # need K/N-tile streaming (pltpu.emit_pipeline) inside the kernel body.

    h = x_p
    use_buffered = True
    for chunk in chunks:
        h, use_buffered = _run_chunk(h, prepared, chunk, tm, m_pad, use_buffered)

    return h[:m, :d_out]


if __name__ == "__main__":
    # Small shapes consistent with the module: batch=8, input_dim=16,
    # hidden_dim=32, num_layers=3, output_dim=8, dropout=0.1 (inactive in eval).
    batch, input_dim, hidden_dim, num_layers, output_dim = 8, 16, 32, 3, 8

    key = jax.random.PRNGKey(0)
    key, kx = jax.random.split(key)
    x = jax.random.normal(kx, (batch, input_dim), jnp.float32)

    layer_params, proj_params = init_ffnn_params(
        key, input_dim, hidden_dim, num_layers, output_dim)
    prepared = prepare_ffnn_params(layer_params, proj_params)   # pad+cast once

    out = ffnn_forward(x, prepared)
    out = jax.block_until_ready(out)

    # Pure-JAX reference using the same mixed-precision path (bf16 matmul
    # operands, f32 accumulation / bias / ReLU).
    bf = jnp.bfloat16
    ref = x
    for (w, b) in layer_params:
        ref = jnp.maximum(
            jnp.dot(ref.astype(bf), w.astype(bf),
                    preferred_element_type=jnp.float32) + b, 0.0)
    ref = jnp.dot(ref.astype(bf), proj_params[0].astype(bf),
                  preferred_element_type=jnp.float32) + proj_params[1]

    assert out.shape == (batch, output_dim)
    assert jnp.allclose(out, ref, atol=2e-2, rtol=2e-2), "mismatch vs reference"

    print("KERNEL_OK")
</pallas_src>

<mosaic_0001>
module attributes {stable_mosaic.version = 11 : i64} {
  func.func @_ffnn_chunk_kernel(%arg0: i32, %arg1: memref<8x128xf32, #tpu.memory_space<vmem>>, %arg2: memref<128x128xbf16, #tpu.memory_space<vmem>>, %arg3: memref<128x128xbf16, #tpu.memory_space<vmem>>, %arg4: memref<128x128xbf16, #tpu.memory_space<vmem>>, %arg5: memref<128x128xbf16, #tpu.memory_space<vmem>>, %arg6: memref<4x128xf32, #tpu.memory_space<vmem>>, %arg7: memref<8x128xf32, #tpu.memory_space<vmem>>, %arg8: memref<8x128xf32, #tpu.memory_space<vmem>>) attributes {dimension_semantics = [#tpu.dimension_semantics<parallel>], iteration_bounds = array<i64: 1>, scalar_prefetch = 0 : i64, scratch_operands = 1 : i64, tpu.core_type = #tpu.core_type<tc>, window_params = [{transform_indices = @transform_0, window_bounds = array<i64: 8, 128>}, {pipeline_mode = #tpu.pipeline_mode<synchronous>, transform_indices = @transform_1, window_bounds = array<i64: 128, 128>}, {pipeline_mode = #tpu.pipeline_mode<synchronous>, transform_indices = @transform_2, window_bounds = array<i64: 128, 128>}, {pipeline_mode = #tpu.pipeline_mode<synchronous>, transform_indices = @transform_3, window_bounds = array<i64: 128, 128>}, {pipeline_mode = #tpu.pipeline_mode<synchronous>, transform_indices = @transform_4, window_bounds = array<i64: 128, 128>}, {pipeline_mode = #tpu.pipeline_mode<synchronous>, transform_indices = @transform_5, window_bounds = array<i64: 4, 128>}, {transform_indices = @transform_6, window_bounds = array<i64: 8, 128>}]} {
    %c0 = arith.constant 0 : index
    %c0_0 = arith.constant 0 : index
    %0 = vector.load %arg1[%c0, %c0_0] : memref<8x128xf32, #tpu.memory_space<vmem>>, vector<8x128xf32>
    %1 = arith.truncf %0 : vector<8x128xf32> to vector<8x128xbf16>
    %c0_1 = arith.constant 0 : index
    %c0_2 = arith.constant 0 : index
    %2 = vector.load %arg2[%c0_1, %c0_2] : memref<128x128xbf16, #tpu.memory_space<vmem>>, vector<128x128xbf16>
    %cst = arith.constant dense<0.000000e+00> : vector<8x128xf32>
    %3 = tpu.matmul %1, %2, %cst {dimension_numbers = #tpu.dot_dimension_numbers<[1], [0], [0], [1], [0, 0, 1, 1], [], []>} : vector<8x128xbf16>, vector<128x128xbf16>, vector<8x128xf32> -> vector<8x128xf32>
    %c0_3 = arith.constant 0 : index
    %c0_4 = arith.constant 0 : index
    %4 = vector.load %arg6[%c0_3, %c0_4] : memref<4x128xf32, #tpu.memory_space<vmem>>, vector<1x128xf32>
    %5 = vector.broadcast %4 : vector<1x128xf32> to vector<8x128xf32>
    %6 = arith.addf %3, %5 : vector<8x128xf32>
    %cst_5 = arith.constant 0.000000e+00 : f32
    %7 = vector.broadcast %cst_5 : f32 to vector<8x128xf32>
    %8 = arith.maximumf %6, %7 : vector<8x128xf32>
    %c0_6 = arith.constant 0 : index
    %c0_7 = arith.constant 0 : index
    %9 = vector.load %arg8[%c0_6, %c0_7] : memref<8x128xf32, #tpu.memory_space<vmem>>, vector<8x128xf32>
    tpu.vector_store %arg8[%c0_6, %c0_7], %8 {strides = array<i32>} : memref<8x128xf32, #tpu.memory_space<vmem>>, vector<8x128xf32>,
    %c0_8 = arith.constant 0 : index
    %c0_9 = arith.constant 0 : index
    %10 = vector.load %arg8[%c0_8, %c0_9] : memref<8x128xf32, #tpu.memory_space<vmem>>, vector<8x128xf32>
    %11 = arith.truncf %10 : vector<8x128xf32> to vector<8x128xbf16>
    %c0_10 = arith.constant 0 : index
    %c0_11 = arith.constant 0 : index
    %12 = vector.load %arg3[%c0_10, %c0_11] : memref<128x128xbf16, #tpu.memory_space<vmem>>, vector<128x128xbf16>
    %cst_12 = arith.constant dense<0.000000e+00> : vector<8x128xf32>
    %13 = tpu.matmul %11, %12, %cst_12 {dimension_numbers = #tpu.dot_dimension_numbers<[1], [0], [0], [1], [0, 0, 1, 1], [], []>} : vector<8x128xbf16>, vector<128x128xbf16>, vector<8x128xf32> -> vector<8x128xf32>
    %c1 = arith.constant 1 : index
    %c0_13 = arith.constant 0 : index
    %14 = vector.load %arg6[%c1, %c0_13] : memref<4x128xf32, #tpu.memory_space<vmem>>, vector<1x128xf32>
    %15 = vector.broadcast %14 : vector<1x128xf32> to vector<8x128xf32>
    %16 = arith.addf %13, %15 : vector<8x128xf32>
    %cst_14 = arith.constant 0.000000e+00 : f32
    %17 = vector.broadcast %cst_14 : f32 to vector<8x128xf32>
    %18 = arith.maximumf %16, %17 : vector<8x128xf32>
    %c0_15 = arith.constant 0 : index
    %c0_16 = arith.constant 0 : index
    %19 = vector.load %arg8[%c0_15, %c0_16] : memref<8x128xf32, #tpu.memory_space<vmem>>, vector<8x128xf32>
    tpu.vector_store %arg8[%c0_15, %c0_16], %18 {strides = array<i32>} : memref<8x128xf32, #tpu.memory_space<vmem>>, vector<8x128xf32>,
    %c0_17 = arith.constant 0 : index
    %c0_18 = arith.constant 0 : index
    %20 = vector.load %arg8[%c0_17, %c0_18] : memref<8x128xf32, #tpu.memory_space<vmem>>, vector<8x128xf32>
    %21 = arith.truncf %20 : vector<8x128xf32> to vector<8x128xbf16>
    %c0_19 = arith.constant 0 : index
    %c0_20 = arith.constant 0 : index
    %22 = vector.load %arg4[%c0_19, %c0_20] : memref<128x128xbf16, #tpu.memory_space<vmem>>, vector<128x128xbf16>
    %cst_21 = arith.constant dense<0.000000e+00> : vector<8x128xf32>
    %23 = tpu.matmul %21, %22, %cst_21 {dimension_numbers = #tpu.dot_dimension_numbers<[1], [0], [0], [1], [0, 0, 1, 1], [], []>} : vector<8x128xbf16>, vector<128x128xbf16>, vector<8x128xf32> -> vector<8x128xf32>
    %c2 = arith.constant 2 : index
    %c0_22 = arith.constant 0 : index
    %24 = vector.load %arg6[%c2, %c0_22] : memref<4x128xf32, #tpu.memory_space<vmem>>, vector<1x128xf32>
    %25 = vector.broadcast %24 : vector<1x128xf32> to vector<8x128xf32>
    %26 = arith.addf %23, %25 : vector<8x128xf32>
    %cst_23 = arith.constant 0.000000e+00 : f32
    %27 = vector.broadcast %cst_23 : f32 to vector<8x128xf32>
    %28 = arith.maximumf %26, %27 : vector<8x128xf32>
    %c0_24 = arith.constant 0 : index
    %c0_25 = arith.constant 0 : index
    %29 = vector.load %arg8[%c0_24, %c0_25] : memref<8x128xf32, #tpu.memory_space<vmem>>, vector<8x128xf32>
    tpu.vector_store %arg8[%c0_24, %c0_25], %28 {strides = array<i32>} : memref<8x128xf32, #tpu.memory_space<vmem>>, vector<8x128xf32>,
    %c0_26 = arith.constant 0 : index
    %c0_27 = arith.constant 0 : index
    %30 = vector.load %arg8[%c0_26, %c0_27] : memref<8x128xf32, #tpu.memory_space<vmem>>, vector<8x128xf32>
    %31 = arith.truncf %30 : vector<8x128xf32> to vector<8x128xbf16>
    %c0_28 = arith.constant 0 : index
    %c0_29 = arith.constant 0 : index
    %32 = vector.load %arg5[%c0_28, %c0_29] : memref<128x128xbf16, #tpu.memory_space<vmem>>, vector<128x128xbf16>
    %cst_30 = arith.constant dense<0.000000e+00> : vector<8x128xf32>
    %33 = tpu.matmul %31, %32, %cst_30 {dimension_numbers = #tpu.dot_dimension_numbers<[1], [0], [0], [1], [0, 0, 1, 1], [], []>} : vector<8x128xbf16>, vector<128x128xbf16>, vector<8x128xf32> -> vector<8x128xf32>
    %c3 = arith.constant 3 : index
    %c0_31 = arith.constant 0 : index
    %34 = vector.load %arg6[%c3, %c0_31] : memref<4x128xf32, #tpu.memory_space<vmem>>, vector<1x128xf32>
    %35 = vector.broadcast %34 : vector<1x128xf32> to vector<8x128xf32>
    %36 = arith.addf %33, %35 : vector<8x128xf32>
    %c0_32 = arith.constant 0 : index
    %c0_33 = arith.constant 0 : index
    %37 = vector.load %arg7[%c0_32, %c0_33] : memref<8x128xf32, #tpu.memory_space<vmem>>, vector<8x128xf32>
    tpu.vector_store %arg7[%c0_32, %c0_33], %36 {strides = array<i32>} : memref<8x128xf32, #tpu.memory_space<vmem>>, vector<8x128xf32>,
    return
  }
  func.func @transform_0(%arg0: i32) -> (i32, i32) {
    %c0_i32 = arith.constant 0 : i32
    %c0_i32_0 = arith.constant 0 : i32
    return %arg0, %c0_i32 : i32, i32
  }
  func.func @transform_1(%arg0: i32) -> (i32, i32) {
    %c0_i32 = arith.constant 0 : i32
    %c0_i32_0 = arith.constant 0 : i32
    %c0_i32_1 = arith.constant 0 : i32
    return %c0_i32, %c0_i32_0 : i32, i32
  }
  func.func @transform_2(%arg0: i32) -> (i32, i32) {
    %c0_i32 = arith.constant 0 : i32
    %c0_i32_0 = arith.constant 0 : i32
    %c0_i32_1 = arith.constant 0 : i32
    return %c0_i32, %c0_i32_0 : i32, i32
  }
  func.func @transform_3(%arg0: i32) -> (i32, i32) {
    %c0_i32 = arith.constant 0 : i32
    %c0_i32_0 = arith.constant 0 : i32
    %c0_i32_1 = arith.constant 0 : i32
    return %c0_i32, %c0_i32_0 : i32, i32
  }
  func.func @transform_4(%arg0: i32) -> (i32, i32) {
    %c0_i32 = arith.constant 0 : i32
    %c0_i32_0 = arith.constant 0 : i32
    %c0_i32_1 = arith.constant 0 : i32
    return %c0_i32, %c0_i32_0 : i32, i32
  }
  func.func @transform_5(%arg0: i32) -> (i32, i32) {
    %c0_i32 = arith.constant 0 : i32
    %c0_i32_0 = arith.constant 0 : i32
    %c0_i32_1 = arith.constant 0 : i32
    return %c0_i32, %c0_i32_0 : i32, i32
  }
  func.func @transform_6(%arg0: i32) -> (i32, i32) {
    %c0_i32 = arith.constant 0 : i32
    %c0_i32_0 = arith.constant 0 : i32
    return %arg0, %c0_i32 : i32, i32
  }
}

module attributes {stable_mosaic.version = 11 : i64} {
  func.func @_ffnn_chunk_kernel(%arg0: i32, %arg1: memref<8x128xf32, #tpu.memory_space<vmem>>, %arg2: memref<128x128xbf16, #tpu.memory_space<vmem>>, %arg3: memref<128x128xbf16, #tpu.memory_space<vmem>>, %arg4: memref<128x128xbf16, #tpu.memory_space<vmem>>, %arg5: memref<128x128xbf16, #tpu.memory_space<vmem>>, %arg6: memref<4x128xf32, #tpu.memory_space<vmem>>, %arg7: memref<8x128xf32, #tpu.memory_space<vmem>>, %arg8: memref<8x128xf32, #tpu.memory_space<vmem>>) attributes {dimension_semantics = [#tpu.dimension_semantics<parallel>], iteration_bounds = array<i64: 1>, scalar_prefetch = 0 : i64, scratch_operands = 1 : i64, tpu.core_type = #tpu.core_type<tc>, window_params = [{transform_indices = @transform_0, window_bounds = array<i64: 8, 128>}, {pipeline_mode = #tpu.pipeline_mode<synchronous>, transform_indices = @transform_1, window_bounds = array<i64: 128, 128>}, {pipeline_mode = #tpu.pipeline_mode<synchronous>, transform_indices = @transform_2, window_bounds = array<i64: 128, 128>}, {pipeline_mode = #tpu.pipeline_mode<synchronous>, transform_indices = @transform_3, window_bounds = array<i64: 128, 128>}, {pipeline_mode = #tpu.pipeline_mode<synchronous>, transform_indices = @transform_4, window_bounds = array<i64: 128, 128>}, {pipeline_mode = #tpu.pipeline_mode<synchronous>, transform_indices = @transform_5, window_bounds = array<i64: 4, 128>}, {transform_indices = @transform_6, window_bounds = array<i64: 8, 128>}]} {
    %c0 = arith.constant 0 : index
    %c0_0 = arith.constant 0 : index
    %0 = vector.load %arg1[%c0, %c0_0] : memref<8x128xf32, #tpu.memory_space<vmem>>, vector<8x128xf32>
    %1 = arith.truncf %0 : vector<8x128xf32> to vector<8x128xbf16>
    %c0_1 = arith.constant 0 : index
    %c0_2 = arith.constant 0 : index
    %2 = vector.load %arg2[%c0_1, %c0_2] : memref<128x128xbf16, #tpu.memory_space<vmem>>, vector<128x128xbf16>
    %cst = arith.constant dense<0.000000e+00> : vector<8x128xf32>
    %3 = tpu.matmul %1, %2, %cst {dimension_numbers = #tpu.dot_dimension_numbers<[1], [0], [0], [1], [0, 0, 1, 1], [], []>} : vector<8x128xbf16>, vector<128x128xbf16>, vector<8x128xf32> -> vector<8x128xf32>
    %c0_3 = arith.constant 0 : index
    %c0_4 = arith.constant 0 : index
    %4 = vector.load %arg6[%c0_3, %c0_4] : memref<4x128xf32, #tpu.memory_space<vmem>>, vector<1x128xf32>
    %5 = vector.broadcast %4 : vector<1x128xf32> to vector<8x128xf32>
    %6 = arith.addf %3, %5 : vector<8x128xf32>
    %cst_5 = arith.constant 0.000000e+00 : f32
    %7 = vector.broadcast %cst_5 : f32 to vector<8x128xf32>
    %8 = arith.maximumf %6, %7 : vector<8x128xf32>
    %c0_6 = arith.constant 0 : index
    %c0_7 = arith.constant 0 : index
    %9 = vector.load %arg8[%c0_6, %c0_7] : memref<8x128xf32, #tpu.memory_space<vmem>>, vector<8x128xf32>
    tpu.vector_store %arg8[%c0_6, %c0_7], %8 {strides = array<i32>} : memref<8x128xf32, #tpu.memory_space<vmem>>, vector<8x128xf32>,
    %c0_8 = arith.constant 0 : index
    %c0_9 = arith.constant 0 : index
    %10 = vector.load %arg8[%c0_8, %c0_9] : memref<8x128xf32, #tpu.memory_space<vmem>>, vector<8x128xf32>
    %11 = arith.truncf %10 : vector<8x128xf32> to vector<8x128xbf16>
    %c0_10 = arith.constant 0 : index
    %c0_11 = arith.constant 0 : index
    %12 = vector.load %arg3[%c0_10, %c0_11] : memref<128x128xbf16, #tpu.memory_space<vmem>>, vector<128x128xbf16>
    %cst_12 = arith.constant dense<0.000000e+00> : vector<8x128xf32>
    %13 = tpu.matmul %11, %12, %cst_12 {dimension_numbers = #tpu.dot_dimension_numbers<[1], [0], [0], [1], [0, 0, 1, 1], [], []>} : vector<8x128xbf16>, vector<128x128xbf16>, vector<8x128xf32> -> vector<8x128xf32>
    %c1 = arith.constant 1 : index
    %c0_13 = arith.constant 0 : index
    %14 = vector.load %arg6[%c1, %c0_13] : memref<4x128xf32, #tpu.memory_space<vmem>>, vector<1x128xf32>
    %15 = vector.broadcast %14 : vector<1x128xf32> to vector<8x128xf32>
    %16 = arith.addf %13, %15 : vector<8x128xf32>
    %cst_14 = arith.constant 0.000000e+00 : f32
    %17 = vector.broadcast %cst_14 : f32 to vector<8x128xf32>
    %18 = arith.maximumf %16, %17 : vector<8x128xf32>
    %c0_15 = arith.constant 0 : index
    %c0_16 = arith.constant 0 : index
    %19 = vector.load %arg8[%c0_15, %c0_16] : memref<8x128xf32, #tpu.memory_space<vmem>>, vector<8x128xf32>
    tpu.vector_store %arg8[%c0_15, %c0_16], %18 {strides = array<i32>} : memref<8x128xf32, #tpu.memory_space<vmem>>, vector<8x128xf32>,
    %c0_17 = arith.constant 0 : index
    %c0_18 = arith.constant 0 : index
    %20 = vector.load %arg8[%c0_17, %c0_18] : memref<8x128xf32, #tpu.memory_space<vmem>>, vector<8x128xf32>
    %21 = arith.truncf %20 : vector<8x128xf32> to vector<8x128xbf16>
    %c0_19 = arith.constant 0 : index
    %c0_20 = arith.constant 0 : index
    %22 = vector.load %arg4[%c0_19, %c0_20] : memref<128x128xbf16, #tpu.memory_space<vmem>>, vector<128x128xbf16>
    %cst_21 = arith.constant dense<0.000000e+00> : vector<8x128xf32>
    %23 = tpu.matmul %21, %22, %cst_21 {dimension_numbers = #tpu.dot_dimension_numbers<[1], [0], [0], [1], [0, 0, 1, 1], [], []>} : vector<8x128xbf16>, vector<128x128xbf16>, vector<8x128xf32> -> vector<8x128xf32>
    %c2 = arith.constant 2 : index
    %c0_22 = arith.constant 0 : index
    %24 = vector.load %arg6[%c2, %c0_22] : memref<4x128xf32, #tpu.memory_space<vmem>>, vector<1x128xf32>
    %25 = vector.broadcast %24 : vector<1x128xf32> to vector<8x128xf32>
    %26 = arith.addf %23, %25 : vector<8x128xf32>
    %cst_23 = arith.constant 0.000000e+00 : f32
    %27 = vector.broadcast %cst_23 : f32 to vector<8x128xf32>
    %28 = arith.maximumf %26, %27 : vector<8x128xf32>
    %c0_24 = arith.constant 0 : index
    %c0_25 = arith.constant 0 : index
    %29 = vector.load %arg8[%c0_24, %c0_25] : memref<8x128xf32, #tpu.memory_space<vmem>>, vector<8x128xf32>
    tpu.vector_store %arg8[%c0_24, %c0_25], %28 {strides = array<i32>} : memref<8x128xf32, #tpu.memory_space<vmem>>, vector<8x128xf32>,
    %c0_26 = arith.constant 0 : index
    %c0_27 = arith.constant 0 : index
    %30 = vector.load %arg8[%c0_26, %c0_27] : memref<8x128xf32, #tpu.memory_space<vmem>>, vector<8x128xf32>
    %31 = arith.truncf %30 : vector<8x128xf32> to vector<8x128xbf16>
    %c0_28 = arith.constant 0 : index
    %c0_29 = arith.constant 0 : index
    %32 = vector.load %arg5[%c0_28, %c0_29] : memref<128x128xbf16, #tpu.memory_space<vmem>>, vector<128x128xbf16>
    %cst_30 = arith.constant dense<0.000000e+00> : vector<8x128xf32>
    %33 = tpu.matmul %31, %32, %cst_30 {dimension_numbers = #tpu.dot_dimension_numbers<[1], [0], [0], [1], [0, 0, 1, 1], [], []>} : vector<8x128xbf16>, vector<128x128xbf16>, vector<8x128xf32> -> vector<8x128xf32>
    %c3 = arith.constant 3 : index
    %c0_31 = arith.constant 0 : index
    %34 = vector.load %arg6[%c3, %c0_31] : memref<4x128xf32, #tpu.memory_space<vmem>>, vector<1x128xf32>
    %35 = vector.broadcast %34 : vector<1x128xf32> to vector<8x128xf32>
    %36 = arith.addf %33, %35 : vector<8x128xf32>
    %c0_32 = arith.constant 0 : index
    %c0_33 = arith.constant 0 : index
    %37 = vector.load %arg7[%c0_32, %c0_33] : memref<8x128xf32, #tpu.memory_space<vmem>>, vector<8x128xf32>
    tpu.vector_store %arg7[%c0_32, %c0_33], %36 {strides = array<i32>} : memref<8x128xf32, #tpu.memory_space<vmem>>, vector<8x128xf32>,
    return
  }
  func.func @transform_0(%arg0: i32) -> (i32, i32) {
    %c0_i32 = arith.constant 0 : i32
    %c0_i32_0 = arith.constant 0 : i32
    return %arg0, %c0_i32 : i32, i32
  }
  func.func @transform_1(%arg0: i32) -> (i32, i32) {
    %c0_i32 = arith.constant 0 : i32
    %c0_i32_0 = arith.constant 0 : i32
    %c0_i32_1 = arith.constant 0 : i32
    return %c0_i32, %c0_i32_0 : i32, i32
  }
  func.func @transform_2(%arg0: i32) -> (i32, i32) {
    %c0_i32 = arith.constant 0 : i32
    %c0_i32_0 = arith.constant 0 : i32
    %c0_i32_1 = arith.constant 0 : i32
    return %c0_i32, %c0_i32_0 : i32, i32
  }
  func.func @transform_3(%arg0: i32) -> (i32, i32) {
    %c0_i32 = arith.constant 0 : i32
    %c0_i32_0 = arith.constant 0 : i32
    %c0_i32_1 = arith.constant 0 : i32
    return %c0_i32, %c0_i32_0 : i32, i32
  }
  func.func @transform_4(%arg0: i32) -> (i32, i32) {
    %c0_i32 = arith.constant 0 : i32
    %c0_i32_0 = arith.constant 0 : i32
    %c0_i32_1 = arith.constant 0 : i32
    return %c0_i32, %c0_i32_0 : i32, i32
  }
  func.func @transform_5(%arg0: i32) -> (i32, i32) {
    %c0_i32 = arith.constant 0 : i32
    %c0_i32_0 = arith.constant 0 : i32
    %c0_i32_1 = arith.constant 0 : i32
    return %c0_i32, %c0_i32_0 : i32, i32
  }
  func.func @transform_6(%arg0: i32) -> (i32, i32) {
    %c0_i32 = arith.constant 0 : i32
    %c0_i32_0 = arith.constant 0 : i32
    return %arg0, %c0_i32 : i32, i32
  }
}

</mosaic_0001>

<bundles_post_ra>
// kernel: tpu_custom_call.1
= control target key start
LH: loop header
LB: loop body
LE: loop exit
PB: predicated region body
PF: predicated region fallthrough
CT: control target
= control target key end

     0   :  { %11 = vsyncpa [#allocation4], 0  ;;  %s1008_s0 = inlined_call_operand.hbm [shape: f32[8,128], index: 0, kind: input, shape index: {}]   ;;  %s1009_s1 = inlined_call_operand.hbm [shape: bf16[128,128], index: 1, kind: input, shape index: {}]   ;;  %s1010_s2 = inlined_call_operand.hbm [shape: bf16[128,128], index: 2, kind: input, shape index: {}]   ;;  %s1011_s3 = inlined_call_operand.hbm [shape: bf16[128,128], index: 3, kind: input, shape index: {}]   ;;  %s1012_s4 = inlined_call_operand.hbm [shape: bf16[128,128], index: 4, kind: input, shape index: {}]   ;;  %s1013_s5 = inlined_call_operand.vmem [shape: f32[4,128], index: 5, kind: input, shape index: {}]   ;;  %s1014_s6 = inlined_call_operand.hbm [shape: f32[8,128], index: 6, kind: output, shape index: {}]  }
   0x1   :  { %12 = vsyncpa [#allocation7], 0 }
   0x2   :  { %13 = vsyncpa [#allocation10], 0 }
   0x3   :  { %14 = vsyncpa [#allocation5], 0  ;;  %s881_s21 = smov [#allocation6]  }
   0x4   :  { %s30_s22 = sshll.u32 %s881_s21, 4  ;;  %s31_s22 = int_to_ptr.vmem [resolvable:$true] %s30_s22 }
   0x5   :  { %s761_s23 = scalar_lea.vmem %s31_s22, 1024  ;;  %p766_p1 = scmp.lt.s32.totalorder %s31_s22, %s31_s22 }
   0x6   :  { %p762_p0 = scmp.ne.s32.totalorder %s31_s22, %s761_s23  ;;  %p767_p2 = scmp.lt.s32.totalorder %s761_s23, %s761_s23 }
   0x8   :  { %p768_p3 = por %p767_p2, %p766_p1 }
   0xa   :  { %p769_p4 = pnand %p768_p3, %p762_p0 }
   0xc   :  { %772 = shalt.err (!%p769_p4)
}
   0xd   :  { %s882_s24 = smov 64   ;;  %s883_s25 = smov 4  }
   0xe   :  { %36 = dma.hbm_to_vmem [thread:$0]  %s1009_s1, 1024, %s31_s22, [#allocation7], %s882_s24, %s882_s24, %s883_s25  }
   0xf   :  { %s884_s28 = smov [#allocation9]   ;;  %s885_s30 = smov [#allocation3]  }
  0x10   :  { %s54_s29 = sshll.u32 %s884_s28, 4  ;;  %s21_s7 = sshll.u32 %s885_s30, 4  ;;  %s55_s29 = int_to_ptr.vmem [resolvable:$true] %s54_s29  ;;  %s22_s7 = int_to_ptr.vmem [resolvable:$true] %s21_s7 }
  0x11   :  { %s781_s8 = scalar_lea.vmem %s55_s29, 1024  ;;  %p786_p6 = scmp.lt.s32.totalorder %s55_s29, %s55_s29 }
  0x12   :  { %p782_p5 = scmp.ne.s32.totalorder %s55_s29, %s781_s8  ;;  %p787_p7 = scmp.lt.s32.totalorder %s781_s8, %s781_s8 }
  0x14   :  { %p788_p8 = por %p787_p7, %p786_p6 }
  0x16   :  { %p789_p9 = pnand %p788_p8, %p782_p5 }
  0x18   :  { %792 = shalt.err (!%p789_p9)
}
  0x19   :  { %60 = dma.hbm_to_vmem [thread:$0]  %s1011_s3, 1024, %s55_s29, [#allocation10], %s882_s24, %s882_s24, %s883_s25  }
  0x1a   :  { %s801_s1 = scalar_lea.vmem %s22_s7, 128  ;;  %p806_p11 = scmp.lt.s32.totalorder %s22_s7, %s22_s7 }
  0x1b   :  { %p802_p10 = scmp.ne.s32.totalorder %s22_s7, %s801_s1  ;;  %p807_p12 = scmp.lt.s32.totalorder %s801_s1, %s801_s1 }
  0x1d   :  { %p808_p13 = por %p807_p12, %p806_p11 }
  0x1f   :  { %p809_p0 = pnand %p808_p13, %p802_p10 }
  0x21   :  { %812 = shalt.err (!%p809_p0)
}
  0x22   :  { %24 = dma.hbm_to_vmem [thread:$0]  %s1008_s0, 128, %s22_s7, [#allocation4]  }
  0x23   :  { %s886_s13 = smov [#allocation8]   ;;  %s887_s15 = smov [#allocation11]  }
  0x24   :  { %s42_s14 = sshll.u32 %s886_s13, 4  ;;  %s66_s16 = sshll.u32 %s887_s15, 4  ;;  %s43_s14 = int_to_ptr.vmem [resolvable:$true] %s42_s14  ;;  %s67_s16 = int_to_ptr.vmem [resolvable:$true] %s66_s16 }
  0x25   :  { %s821_s17 = scalar_lea.vmem %s43_s14, 1024  ;;  %p826_p2 = scmp.lt.s32.totalorder %s43_s14, %s43_s14 }
  0x26   :  { %p822_p1 = scmp.ne.s32.totalorder %s43_s14, %s821_s17  ;;  %p827_p3 = scmp.lt.s32.totalorder %s821_s17, %s821_s17 }
  0x28   :  { %p828_p4 = por %p827_p3, %p826_p2 }
  0x2a   :  { %p829_p5 = pnand %p828_p4, %p822_p1 }
  0x2c   :  { %832 = shalt.err (!%p829_p5)
}
  0x2d   :  { %48 = dma.hbm_to_vmem [thread:$0]  %s1010_s2, 1024, %s43_s14, [#allocation7], %s882_s24, %s882_s24, %s883_s25  }
  0x2e   :  { %s841_s0 = scalar_lea.vmem %s67_s16, 1024  ;;  %p846_p7 = scmp.lt.s32.totalorder %s67_s16, %s67_s16 }
  0x2f   :  { %p842_p6 = scmp.ne.s32.totalorder %s67_s16, %s841_s0  ;;  %p847_p8 = scmp.lt.s32.totalorder %s841_s0, %s841_s0 }
  0x31   :  { %p848_p9 = por %p847_p8, %p846_p7 }
  0x33   :  { %p849_p10 = pnand %p848_p9, %p842_p6 }
  0x35   :  { %852 = shalt.err (!%p849_p10)
}
  0x36   :  { %72 = dma.hbm_to_vmem [thread:$0]  %s1012_s4, 1024, %s67_s16, [#allocation10], %s882_s24, %s882_s24, %s883_s25  }
  0x37   :  { %873 = dma.done.wait [#allocation4], 128  }
  0x38   :  { %874 = vsyncadd [#allocation4], 4294967168 }
  0x39   :  { %875 = dma.done.wait [#allocation7], 2048  }
  0x3a   :  { %876 = vsyncadd [#allocation7], 4294965248 }
  0x3b   :  { %877 = dma.done.wait [#allocation10], 2048  }
  0x3c   :  { %878 = vsyncadd [#allocation10], 4294965248  ;;  %v888_v0 = vmov 0.0   ;;  %vm889_vm0 = vmmov 0   ;;  %v721_v1 = vld [vmem:[#allocation6 + $0x38] sm:$0xff]   ;;  %v722_v2 = vld [vmem:[#allocation6 + $0x30] sm:$0xff]  }
  0x3d   :  { %631 = vmatprep.subr.bf16.mxu0 %v888_v0  ;;  %647 = vmatprep.mubr.msk.bf16.mxu0 %vm889_vm0, %v888_v0  ;;  %v723_v3 = vld [vmem:[#allocation6 + $0x28] sm:$0xff]   ;;  %v729_v4 = vld [vmem:[#allocation8 + $0x38] sm:$0xff]   ;;  %v724_v5 = vld [vmem:[#allocation6 + $0x20] sm:$0xff]   ;;  %s890_s27 = smov [#allocation12]  }
  0x3e   :  { %651 = vmatprep.subr.bf16.mxu1 %v888_v0  ;;  %667 = vmatprep.mubr.msk.bf16.mxu1 %vm889_vm0, %v888_v0  ;;  %v730_v6 = vld [vmem:[#allocation8 + $0x30] sm:$0xff]   ;;  %v725_v7 = vld [vmem:[#allocation6 + $0x18] sm:$0xff]   ;;  %v731_v8 = vld [vmem:[#allocation8 + $0x28] sm:$0xff]   ;;  %s548_s28 = sshll.u32 %s890_s27, 4  ;;  %s549_s28 = int_to_ptr.vmem [resolvable:$true] %s548_s28 }
  0x3f   :  { %632 = vmatpush3.bf16.msra.mxu0 %v721_v1  ;;  %652 = vmatpush3.bf16.msra.mxu1 %v729_v4  ;;  %v726_v9 = vld [vmem:[#allocation6 + $0x10] sm:$0xff]   ;;  %v732_v10 = vld [vmem:[#allocation8 + $0x20] sm:$0xff]   ;;  %v727_v11 = vld [vmem:[#allocation6 + $0x8] sm:$0xff]   ;;  %s853_s29 = scalar_lea.vmem %s549_s28, 128  ;;  %p858_p12 = scmp.lt.s32.totalorder %s549_s28, %s549_s28 }
  0x40   :  { %633 = vmatprep.subr.bf16.mxu0 %v888_v0  ;;  %653 = vmatprep.subr.bf16.mxu1 %v888_v0  ;;  %v733_v12 = vld [vmem:[#allocation8 + $0x18] sm:$0xff]   ;;  %v728_v13 = vld [vmem:[#allocation6] sm:$0xff]   ;;  %v734_v15 = vld [vmem:[#allocation8 + $0x10] sm:$0xff]   ;;  %p854_p11 = scmp.ne.s32.totalorder %s549_s28, %s853_s29  ;;  %p859_p13 = scmp.lt.s32.totalorder %s853_s29, %s853_s29 }
  0x41   :  { %v91_v14 = vld [vmem:[#allocation3] sm:$0xff]  ;;  %v735_v17 = vld [vmem:[#allocation8 + $0x8] sm:$0xff]   ;;  %v736_v18 = vld [vmem:[#allocation8] sm:$0xff]  }
  0x42   :  { %v92_v16 = vpack.c.bf16 %v91_v14, %v91_v14  ;;  %v737_v19 = vld [vmem:[#allocation9 + $0x38] sm:$0xff]   ;;  %v738_v20 = vld [vmem:[#allocation9 + $0x30] sm:$0xff]   ;;  %v739_v21 = vld [vmem:[#allocation9 + $0x28] sm:$0xff]   ;;  %p860_p0 = por %p859_p13, %p858_p12 }
  0x43   :  { %634 = vmatpush3.bf16.msra.mxu0 %v722_v2  ;;  %654 = vmatpush3.bf16.msra.mxu1 %v730_v6  ;;  %v740_v22 = vld [vmem:[#allocation9 + $0x20] sm:$0xff]   ;;  %v741_v23 = vld [vmem:[#allocation9 + $0x18] sm:$0xff]   ;;  %v742_v24 = vld [vmem:[#allocation9 + $0x10] sm:$0xff]  }
  0x44   :  { %635 = vmatprep.subr.bf16.mxu0 %v888_v0  ;;  %655 = vmatprep.subr.bf16.mxu1 %v888_v0  ;;  %v559_v25 = vld [vmem:[%s1013_s5] ss:$0 sm:$0xff]  ;;  %v743_v33 = vld [vmem:[#allocation9 + $0x8] sm:$0xff]   ;;  %v744_v34 = vld [vmem:[#allocation9] sm:$0xff]   ;;  %p861_p1 = pnand %p860_p0, %p854_p11 }
  0x45   :  { %v745_v35 = vld [vmem:[#allocation11 + $0x38] sm:$0xff]   ;;  %v746_v36 = vld [vmem:[#allocation11 + $0x30] sm:$0xff]   ;;  %v747_v37 = vld [vmem:[#allocation11 + $0x28] sm:$0xff]  }
  0x46   :  { %v748_v38 = vld [vmem:[#allocation11 + $0x20] sm:$0xff]   ;;  %v749_v39 = vld [vmem:[#allocation11 + $0x18] sm:$0xff]   ;;  %v750_v40 = vld [vmem:[#allocation11 + $0x10] sm:$0xff]  }
  0x47   :  { %636 = vmatpush3.bf16.msra.mxu0 %v723_v3  ;;  %656 = vmatpush3.bf16.msra.mxu1 %v731_v8  ;;  %v568_v41 = vld [vmem:[%s1013_s5 + $0x1] ss:$0 sm:$0xff]  ;;  %v751_v49 = vld [vmem:[#allocation11 + $0x8] sm:$0xff]   ;;  %v752_v50 = vld [vmem:[#allocation11] sm:$0xff]  }
  0x48   :  { %637 = vmatprep.subr.bf16.mxu0 %v888_v0  ;;  %657 = vmatprep.subr.bf16.mxu1 %v888_v0  ;;  %v577_v51 = vld [vmem:[%s1013_s5 + $0x2] ss:$0 sm:$0xff]  ;;  %v586_v59 = vld [vmem:[%s1013_s5 + $0x3] ss:$0 sm:$0xff] }
  0x4b   :  { %638 = vmatpush3.bf16.msra.mxu0 %v724_v5  ;;  %658 = vmatpush3.bf16.msra.mxu1 %v732_v10 }
  0x4c   :  { %639 = vmatprep.subr.bf16.mxu0 %v888_v0  ;;  %659 = vmatprep.subr.bf16.mxu1 %v888_v0 }
  0x4f   :  { %640 = vmatpush3.bf16.msra.mxu0 %v725_v7  ;;  %660 = vmatpush3.bf16.msra.mxu1 %v733_v12 }
  0x50   :  { %641 = vmatprep.subr.bf16.mxu0 %v888_v0  ;;  %661 = vmatprep.subr.bf16.mxu1 %v888_v0 }
  0x53   :  { %642 = vmatpush3.bf16.msra.mxu0 %v726_v9  ;;  %662 = vmatpush3.bf16.msra.mxu1 %v734_v15 }
  0x54   :  { %643 = vmatprep.subr.bf16.mxu0 %v888_v0  ;;  %663 = vmatprep.subr.bf16.mxu1 %v888_v0 }
  0x57   :  { %644 = vmatpush3.bf16.msra.mxu0 %v727_v11  ;;  %664 = vmatpush3.bf16.msra.mxu1 %v735_v17 }
  0x58   :  { %645 = vmatprep.subr.bf16.mxu0 %v888_v0  ;;  %665 = vmatprep.subr.bf16.mxu1 %v888_v0 }
  0x5b   :  { %646 = vmatpush3.bf16.msra.mxu0 %v728_v13  ;;  %666 = vmatpush3.bf16.msra.mxu1 %v736_v18 }
  0x5c   :  { %671 = vmatprep.subr.bf16.mxu0 %v888_v0  ;;  %691 = vmatprep.subr.bf16.mxu1 %v888_v0 }
  0x5e   :  { %648 = vmatmul.mubr.bf16.vlgmr.msra.gmra.mxu0 %v92_v16 }
  0x5f   :  { %687 = vmatprep.mubr.msk.bf16.mxu0 %vm889_vm0, %v888_v0  ;;  %672 = vmatpush3.bf16.msra.mxu0 %v737_v19 }
  0x60   :  { %673 = vmatprep.subr.bf16.mxu0 %v888_v0 }
  0x63   :  { %674 = vmatpush3.bf16.msra.mxu0 %v738_v20 }
  0x64   :  { %675 = vmatprep.subr.bf16.mxu0 %v888_v0 }
  0x67   :  { %676 = vmatpush3.bf16.msra.mxu0 %v739_v21 }
  0x68   :  { %677 = vmatprep.subr.bf16.mxu0 %v888_v0 }
  0x6b   :  { %678 = vmatpush3.bf16.msra.mxu0 %v740_v22 }
  0x6c   :  { %679 = vmatprep.subr.bf16.mxu0 %v888_v0 }
  0x6f   :  { %680 = vmatpush3.bf16.msra.mxu0 %v741_v23 }
  0x70   :  { %681 = vmatprep.subr.bf16.mxu0 %v888_v0 }
  0x73   :  { %682 = vmatpush3.bf16.msra.mxu0 %v742_v24 }
  0x74   :  { %683 = vmatprep.subr.bf16.mxu0 %v888_v0 }
  0x77   :  { %684 = vmatpush3.bf16.msra.mxu0 %v743_v33 }
  0x78   :  { %685 = vmatprep.subr.bf16.mxu0 %v888_v0 }
  0x7b   :  { %686 = vmatpush3.bf16.msra.mxu0 %v744_v34 }
 0x11e   :  { %v196_v26 = vpop.f32.mrf.mxu0 }
 0x11f   :  { %v197_v27 = vadd.f32 %v559_v25, %v196_v26 }
 0x120   :  { %v649_v28 = vpop.f32.mrf.mxu0 }
 0x121   :  { %v202_v29 = vmax.f32 %v197_v27, 0.0 }
 0x122   :  { %v199_v30 = vpop.f32.mrf.mxu0 }
 0x123   :  { %v205_v31 = vpack.c.bf16 %v202_v29, %v202_v29 }
 0x124   :  { %v650_v32 = vpop.f32.mrf.mxu0 }
 0x125   :  { %668 = vmatmul.mubr.bf16.vlgmr.msra.gmra.mxu1 %v205_v31 }
 0x126   :  { %707 = vmatprep.mubr.msk.bf16.mxu1 %vm889_vm0, %v888_v0  ;;  %692 = vmatpush3.bf16.msra.mxu1 %v745_v35 }
 0x127   :  { %693 = vmatprep.subr.bf16.mxu1 %v888_v0 }
 0x12a   :  { %694 = vmatpush3.bf16.msra.mxu1 %v746_v36 }
 0x12b   :  { %695 = vmatprep.subr.bf16.mxu1 %v888_v0 }
 0x12e   :  { %696 = vmatpush3.bf16.msra.mxu1 %v747_v37 }
 0x12f   :  { %697 = vmatprep.subr.bf16.mxu1 %v888_v0 }
 0x132   :  { %698 = vmatpush3.bf16.msra.mxu1 %v748_v38 }
 0x133   :  { %699 = vmatprep.subr.bf16.mxu1 %v888_v0 }
 0x136   :  { %700 = vmatpush3.bf16.msra.mxu1 %v749_v39 }
 0x137   :  { %701 = vmatprep.subr.bf16.mxu1 %v888_v0 }
 0x13a   :  { %702 = vmatpush3.bf16.msra.mxu1 %v750_v40 }
 0x13b   :  { %703 = vmatprep.subr.bf16.mxu1 %v888_v0 }
 0x13e   :  { %704 = vmatpush3.bf16.msra.mxu1 %v751_v49 }
 0x13f   :  { %705 = vmatprep.subr.bf16.mxu1 %v888_v0 }
 0x142   :  { %706 = vmatpush3.bf16.msra.mxu1 %v752_v50 }
 0x1e5   :  { %v309_v42 = vpop.f32.mrf.mxu1 }
 0x1e6   :  { %v310_v43 = vadd.f32 %v568_v41, %v309_v42 }
 0x1e7   :  { %v669_v44 = vpop.f32.mrf.mxu1 }
 0x1e8   :  { %v315_v45 = vmax.f32 %v310_v43, 0.0 }
 0x1e9   :  { %v312_v46 = vpop.f32.mrf.mxu1 }
 0x1ea   :  { %v318_v47 = vpack.c.bf16 %v315_v45, %v315_v45 }
 0x1eb   :  { %v670_v48 = vpop.f32.mrf.mxu1 }
 0x1ec   :  { %688 = vmatmul.mubr.bf16.vlgmr.msra.gmra.mxu0 %v318_v47 }
 0x2ac   :  { %v422_v52 = vpop.f32.mrf.mxu0 }
 0x2ad   :  { %v423_v53 = vadd.f32 %v577_v51, %v422_v52 }
 0x2ae   :  { %v689_v54 = vpop.f32.mrf.mxu0 }
 0x2af   :  { %v428_v55 = vmax.f32 %v423_v53, 0.0 }
 0x2b0   :  { %v425_v56 = vpop.f32.mrf.mxu0 }
 0x2b1   :  { %v431_v57 = vpack.c.bf16 %v428_v55, %v428_v55 }
 0x2b2   :  { %v690_v58 = vpop.f32.mrf.mxu0 }
 0x2b3   :  { %708 = vmatmul.mubr.bf16.vlgmr.msra.gmra.mxu1 %v431_v57 }
 0x373   :  { %v535_v60 = vpop.f32.mrf.mxu1 }
 0x374   :  { %v536_v61 = vadd.f32 %v586_v59, %v535_v60 }
 0x375   :  { %v709_v62 = vpop.f32.mrf.mxu1 }
 0x376   :  { %541 = vst [vmem:[#allocation12] sm:$0xff] %v536_v61 }
 0x377   :  { %v538_v63 = vpop.f32.mrf.mxu1 }
 0x378   :  { %864 = shalt.err (!%p861_p1)
}
 0x379   :  { %551 = dma.vmem_to_hbm [thread:$0]  %s549_s28, 128, %s1014_s6, [#allocation5]   ;;  %v710_v0 = vpop.f32.mrf.mxu1 }
 0x37a   :  { %879 = dma.done.wait [#allocation5], 128  }
 0x37b   :  { %880 = vsyncadd [#allocation5], 4294967168 }
 0x37c   :  { %555 = vsyncpa [#allocation4], 1 }
 0x37d   :  { %556 = vsyncpa [#allocation7], 1 }
 0x37e   :  { %557 = vsyncpa [#allocation10], 1 }
 0x37f   :  { %558 = vsyncpa [#allocation5], 1 }

// kernel: tpu_custom_call.1
= control target key start
LH: loop header
LB: loop body
LE: loop exit
PB: predicated region body
PF: predicated region fallthrough
CT: control target
= control target key end

     0   :  { %11 = vsyncpa [#allocation4], 0  ;;  %s1008_s0 = inlined_call_operand.hbm [shape: f32[8,128], index: 0, kind: input, shape index: {}]   ;;  %s1009_s1 = inlined_call_operand.hbm [shape: bf16[128,128], index: 1, kind: input, shape index: {}]   ;;  %s1010_s2 = inlined_call_operand.hbm [shape: bf16[128,128], index: 2, kind: input, shape index: {}]   ;;  %s1011_s3 = inlined_call_operand.hbm [shape: bf16[128,128], index: 3, kind: input, shape index: {}]   ;;  %s1012_s4 = inlined_call_operand.hbm [shape: bf16[128,128], index: 4, kind: input, shape index: {}]   ;;  %s1013_s5 = inlined_call_operand.vmem [shape: f32[4,128], index: 5, kind: input, shape index: {}]   ;;  %s1014_s6 = inlined_call_operand.hbm [shape: f32[8,128], index: 6, kind: output, shape index: {}]  }
   0x1   :  { %12 = vsyncpa [#allocation7], 0 }
   0x2   :  { %13 = vsyncpa [#allocation10], 0 }
   0x3   :  { %14 = vsyncpa [#allocation5], 0  ;;  %s881_s21 = smov [#allocation6]  }
   0x4   :  { %s30_s22 = sshll.u32 %s881_s21, 4  ;;  %s31_s22 = int_to_ptr.vmem [resolvable:$true] %s30_s22 }
   0x5   :  { %s761_s23 = scalar_lea.vmem %s31_s22, 1024  ;;  %p766_p1 = scmp.lt.s32.totalorder %s31_s22, %s31_s22 }
   0x6   :  { %p762_p0 = scmp.ne.s32.totalorder %s31_s22, %s761_s23  ;;  %p767_p2 = scmp.lt.s32.totalorder %s761_s23, %s761_s23 }
   0x8   :  { %p768_p3 = por %p767_p2, %p766_p1 }
   0xa   :  { %p769_p4 = pnand %p768_p3, %p762_p0 }
   0xc   :  { %772 = shalt.err (!%p769_p4)
}
   0xd   :  { %s882_s24 = smov 64   ;;  %s883_s25 = smov 4  }
   0xe   :  { %36 = dma.hbm_to_vmem [thread:$0]  %s1009_s1, 1024, %s31_s22, [#allocation7], %s882_s24, %s882_s24, %s883_s25  }
   0xf   :  { %s884_s28 = smov [#allocation9]   ;;  %s885_s30 = smov [#allocation3]  }
  0x10   :  { %s54_s29 = sshll.u32 %s884_s28, 4  ;;  %s21_s7 = sshll.u32 %s885_s30, 4  ;;  %s55_s29 = int_to_ptr.vmem [resolvable:$true] %s54_s29  ;;  %s22_s7 = int_to_ptr.vmem [resolvable:$true] %s21_s7 }
  0x11   :  { %s781_s8 = scalar_lea.vmem %s55_s29, 1024  ;;  %p786_p6 = scmp.lt.s32.totalorder %s55_s29, %s55_s29 }
  0x12   :  { %p782_p5 = scmp.ne.s32.totalorder %s55_s29, %s781_s8  ;;  %p787_p7 = scmp.lt.s32.totalorder %s781_s8, %s781_s8 }
  0x14   :  { %p788_p8 = por %p787_p7, %p786_p6 }
  0x16   :  { %p789_p9 = pnand %p788_p8, %p782_p5 }
  0x18   :  { %792 = shalt.err (!%p789_p9)
}
  0x19   :  { %60 = dma.hbm_to_vmem [thread:$0]  %s1011_s3, 1024, %s55_s29, [#allocation10], %s882_s24, %s882_s24, %s883_s25  }
  0x1a   :  { %s801_s1 = scalar_lea.vmem %s22_s7, 128  ;;  %p806_p11 = scmp.lt.s32.totalorder %s22_s7, %s22_s7 }
  0x1b   :  { %p802_p10 = scmp.ne.s32.totalorder %s22_s7, %s801_s1  ;;  %p807_p12 = scmp.lt.s32.totalorder %s801_s1, %s801_s1 }
  0x1d   :  { %p808_p13 = por %p807_p12, %p806_p11 }
  0x1f   :  { %p809_p0 = pnand %p808_p13, %p802_p10 }
  0x21   :  { %812 = shalt.err (!%p809_p0)
}
  0x22   :  { %24 = dma.hbm_to_vmem [thread:$0]  %s1008_s0, 128, %s22_s7, [#allocation4]  }
  0x23   :  { %s886_s13 = smov [#allocation8]   ;;  %s887_s15 = smov [#allocation11]  }
  0x24   :  { %s42_s14 = sshll.u32 %s886_s13, 4  ;;  %s66_s16 = sshll.u32 %s887_s15, 4  ;;  %s43_s14 = int_to_ptr.vmem [resolvable:$true] %s42_s14  ;;  %s67_s16 = int_to_ptr.vmem [resolvable:$true] %s66_s16 }
  0x25   :  { %s821_s17 = scalar_lea.vmem %s43_s14, 1024  ;;  %p826_p2 = scmp.lt.s32.totalorder %s43_s14, %s43_s14 }
  0x26   :  { %p822_p1 = scmp.ne.s32.totalorder %s43_s14, %s821_s17  ;;  %p827_p3 = scmp.lt.s32.totalorder %s821_s17, %s821_s17 }
  0x28   :  { %p828_p4 = por %p827_p3, %p826_p2 }
  0x2a   :  { %p829_p5 = pnand %p828_p4, %p822_p1 }
  0x2c   :  { %832 = shalt.err (!%p829_p5)
}
  0x2d   :  { %48 = dma.hbm_to_vmem [thread:$0]  %s1010_s2, 1024, %s43_s14, [#allocation7], %s882_s24, %s882_s24, %s883_s25  }
  0x2e   :  { %s841_s0 = scalar_lea.vmem %s67_s16, 1024  ;;  %p846_p7 = scmp.lt.s32.totalorder %s67_s16, %s67_s16 }
  0x2f   :  { %p842_p6 = scmp.ne.s32.totalorder %s67_s16, %s841_s0  ;;  %p847_p8 = scmp.lt.s32.totalorder %s841_s0, %s841_s0 }
  0x31   :  { %p848_p9 = por %p847_p8, %p846_p7 }
  0x33   :  { %p849_p10 = pnand %p848_p9, %p842_p6 }
  0x35   :  { %852 = shalt.err (!%p849_p10)
}
  0x36   :  { %72 = dma.hbm_to_vmem [thread:$0]  %s1012_s4, 1024, %s67_s16, [#allocation10], %s882_s24, %s882_s24, %s883_s25  }
  0x37   :  { %873 = dma.done.wait [#allocation4], 128  }
  0x38   :  { %874 = vsyncadd [#allocation4], 4294967168 }
  0x39   :  { %875 = dma.done.wait [#allocation7], 2048  }
  0x3a   :  { %876 = vsyncadd [#allocation7], 4294965248 }
  0x3b   :  { %877 = dma.done.wait [#allocation10], 2048  }
  0x3c   :  { %878 = vsyncadd [#allocation10], 4294965248  ;;  %v888_v0 = vmov 0.0   ;;  %vm889_vm0 = vmmov 0   ;;  %v721_v1 = vld [vmem:[#allocation6 + $0x38] sm:$0xff]   ;;  %v722_v2 = vld [vmem:[#allocation6 + $0x30] sm:$0xff]  }
  0x3d   :  { %631 = vmatprep.subr.bf16.mxu0 %v888_v0  ;;  %647 = vmatprep.mubr.msk.bf16.mxu0 %vm889_vm0, %v888_v0  ;;  %v723_v3 = vld [vmem:[#allocation6 + $0x28] sm:$0xff]   ;;  %v729_v4 = vld [vmem:[#allocation8 + $0x38] sm:$0xff]   ;;  %v724_v5 = vld [vmem:[#allocation6 + $0x20] sm:$0xff]   ;;  %s890_s27 = smov [#allocation12]  }
  0x3e   :  { %651 = vmatprep.subr.bf16.mxu1 %v888_v0  ;;  %667 = vmatprep.mubr.msk.bf16.mxu1 %vm889_vm0, %v888_v0  ;;  %v730_v6 = vld [vmem:[#allocation8 + $0x30] sm:$0xff]   ;;  %v725_v7 = vld [vmem:[#allocation6 + $0x18] sm:$0xff]   ;;  %v731_v8 = vld [vmem:[#allocation8 + $0x28] sm:$0xff]   ;;  %s548_s28 = sshll.u32 %s890_s27, 4  ;;  %s549_s28 = int_to_ptr.vmem [resolvable:$true] %s548_s28 }
  0x3f   :  { %632 = vmatpush3.bf16.msra.mxu0 %v721_v1  ;;  %652 = vmatpush3.bf16.msra.mxu1 %v729_v4  ;;  %v726_v9 = vld [vmem:[#allocation6 + $0x10] sm:$0xff]   ;;  %v732_v10 = vld [vmem:[#allocation8 + $0x20] sm:$0xff]   ;;  %v727_v11 = vld [vmem:[#allocation6 + $0x8] sm:$0xff]   ;;  %s853_s29 = scalar_lea.vmem %s549_s28, 128  ;;  %p858_p12 = scmp.lt.s32.totalorder %s549_s28, %s549_s28 }
  0x40   :  { %633 = vmatprep.subr.bf16.mxu0 %v888_v0  ;;  %653 = vmatprep.subr.bf16.mxu1 %v888_v0  ;;  %v733_v12 = vld [vmem:[#allocation8 + $0x18] sm:$0xff]   ;;  %v728_v13 = vld [vmem:[#allocation6] sm:$0xff]   ;;  %v734_v15 = vld [vmem:[#allocation8 + $0x10] sm:$0xff]   ;;  %p854_p11 = scmp.ne.s32.totalorder %s549_s28, %s853_s29  ;;  %p859_p13 = scmp.lt.s32.totalorder %s853_s29, %s853_s29 }
  0x41   :  { %v91_v14 = vld [vmem:[#allocation3] sm:$0xff]  ;;  %v735_v17 = vld [vmem:[#allocation8 + $0x8] sm:$0xff]   ;;  %v736_v18 = vld [vmem:[#allocation8] sm:$0xff]  }
  0x42   :  { %v92_v16 = vpack.c.bf16 %v91_v14, %v91_v14  ;;  %v737_v19 = vld [vmem:[#allocation9 + $0x38] sm:$0xff]   ;;  %v738_v20 = vld [vmem:[#allocation9 + $0x30] sm:$0xff]   ;;  %v739_v21 = vld [vmem:[#allocation9 + $0x28] sm:$0xff]   ;;  %p860_p0 = por %p859_p13, %p858_p12 }
  0x43   :  { %634 = vmatpush3.bf16.msra.mxu0 %v722_v2  ;;  %654 = vmatpush3.bf16.msra.mxu1 %v730_v6  ;;  %v740_v22 = vld [vmem:[#allocation9 + $0x20] sm:$0xff]   ;;  %v741_v23 = vld [vmem:[#allocation9 + $0x18] sm:$0xff]   ;;  %v742_v24 = vld [vmem:[#allocation9 + $0x10] sm:$0xff]  }
  0x44   :  { %635 = vmatprep.subr.bf16.mxu0 %v888_v0  ;;  %655 = vmatprep.subr.bf16.mxu1 %v888_v0  ;;  %v559_v25 = vld [vmem:[%s1013_s5] ss:$0 sm:$0xff]  ;;  %v743_v33 = vld [vmem:[#allocation9 + $0x8] sm:$0xff]   ;;  %v744_v34 = vld [vmem:[#allocation9] sm:$0xff]   ;;  %p861_p1 = pnand %p860_p0, %p854_p11 }
  0x45   :  { %v745_v35 = vld [vmem:[#allocation11 + $0x38] sm:$0xff]   ;;  %v746_v36 = vld [vmem:[#allocation11 + $0x30] sm:$0xff]   ;;  %v747_v37 = vld [vmem:[#allocation11 + $0x28] sm:$0xff]  }
  0x46   :  { %v748_v38 = vld [vmem:[#allocation11 + $0x20] sm:$0xff]   ;;  %v749_v39 = vld [vmem:[#allocation11 + $0x18] sm:$0xff]   ;;  %v750_v40 = vld [vmem:[#allocation11 + $0x10] sm:$0xff]  }
  0x47   :  { %636 = vmatpush3.bf16.msra.mxu0 %v723_v3  ;;  %656 = vmatpush3.bf16.msra.mxu1 %v731_v8  ;;  %v568_v41 = vld [vmem:[%s1013_s5 + $0x1] ss:$0 sm:$0xff]  ;;  %v751_v49 = vld [vmem:[#allocation11 + $0x8] sm:$0xff]   ;;  %v752_v50 = vld [vmem:[#allocation11] sm:$0xff]  }
  0x48   :  { %637 = vmatprep.subr.bf16.mxu0 %v888_v0  ;;  %657 = vmatprep.subr.bf16.mxu1 %v888_v0  ;;  %v577_v51 = vld [vmem:[%s1013_s5 + $0x2] ss:$0 sm:$0xff]  ;;  %v586_v59 = vld [vmem:[%s1013_s5 + $0x3] ss:$0 sm:$0xff] }
  0x4b   :  { %638 = vmatpush3.bf16.msra.mxu0 %v724_v5  ;;  %658 = vmatpush3.bf16.msra.mxu1 %v732_v10 }
  0x4c   :  { %639 = vmatprep.subr.bf16.mxu0 %v888_v0  ;;  %659 = vmatprep.subr.bf16.mxu1 %v888_v0 }
  0x4f   :  { %640 = vmatpush3.bf16.msra.mxu0 %v725_v7  ;;  %660 = vmatpush3.bf16.msra.mxu1 %v733_v12 }
  0x50   :  { %641 = vmatprep.subr.bf16.mxu0 %v888_v0  ;;  %661 = vmatprep.subr.bf16.mxu1 %v888_v0 }
  0x53   :  { %642 = vmatpush3.bf16.msra.mxu0 %v726_v9  ;;  %662 = vmatpush3.bf16.msra.mxu1 %v734_v15 }
  0x54   :  { %643 = vmatprep.subr.bf16.mxu0 %v888_v0  ;;  %663 = vmatprep.subr.bf16.mxu1 %v888_v0 }
  0x57   :  { %644 = vmatpush3.bf16.msra.mxu0 %v727_v11  ;;  %664 = vmatpush3.bf16.msra.mxu1 %v735_v17 }
  0x58   :  { %645 = vmatprep.subr.bf16.mxu0 %v888_v0  ;;  %665 = vmatprep.subr.bf16.mxu1 %v888_v0 }
  0x5b   :  { %646 = vmatpush3.bf16.msra.mxu0 %v728_v13  ;;  %666 = vmatpush3.bf16.msra.mxu1 %v736_v18 }
  0x5c   :  { %671 = vmatprep.subr.bf16.mxu0 %v888_v0  ;;  %691 = vmatprep.subr.bf16.mxu1 %v888_v0 }
  0x5e   :  { %648 = vmatmul.mubr.bf16.vlgmr.msra.gmra.mxu0 %v92_v16 }
  0x5f   :  { %687 = vmatprep.mubr.msk.bf16.mxu0 %vm889_vm0, %v888_v0  ;;  %672 = vmatpush3.bf16.msra.mxu0 %v737_v19 }
  0x60   :  { %673 = vmatprep.subr.bf16.mxu0 %v888_v0 }
  0x63   :  { %674 = vmatpush3.bf16.msra.mxu0 %v738_v20 }
  0x64   :  { %675 = vmatprep.subr.bf16.mxu0 %v888_v0 }
  0x67   :  { %676 = vmatpush3.bf16.msra.mxu0 %v739_v21 }
  0x68   :  { %677 = vmatprep.subr.bf16.mxu0 %v888_v0 }
  0x6b   :  { %678 = vmatpush3.bf16.msra.mxu0 %v740_v22 }
  0x6c   :  { %679 = vmatprep.subr.bf16.mxu0 %v888_v0 }
  0x6f   :  { %680 = vmatpush3.bf16.msra.mxu0 %v741_v23 }
  0x70   :  { %681 = vmatprep.subr.bf16.mxu0 %v888_v0 }
  0x73   :  { %682 = vmatpush3.bf16.msra.mxu0 %v742_v24 }
  0x74   :  { %683 = vmatprep.subr.bf16.mxu0 %v888_v0 }
  0x77   :  { %684 = vmatpush3.bf16.msra.mxu0 %v743_v33 }
  0x78   :  { %685 = vmatprep.subr.bf16.mxu0 %v888_v0 }
  0x7b   :  { %686 = vmatpush3.bf16.msra.mxu0 %v744_v34 }
 0x11e   :  { %v196_v26 = vpop.f32.mrf.mxu0 }
 0x11f   :  { %v197_v27 = vadd.f32 %v559_v25, %v196_v26 }
 0x120   :  { %v649_v28 = vpop.f32.mrf.mxu0 }
 0x121   :  { %v202_v29 = vmax.f32 %v197_v27, 0.0 }
 0x122   :  { %v199_v30 = vpop.f32.mrf.mxu0 }
 0x123   :  { %v205_v31 = vpack.c.bf16 %v202_v29, %v202_v29 }
 0x124   :  { %v650_v32 = vpop.f32.mrf.mxu0 }
 0x125   :  { %668 = vmatmul.mubr.bf16.vlgmr.msra.gmra.mxu1 %v205_v31 }
 0x126   :  { %707 = vmatprep.mubr.msk.bf16.mxu1 %vm889_vm0, %v888_v0  ;;  %692 = vmatpush3.bf16.msra.mxu1 %v745_v35 }
 0x127   :  { %693 = vmatprep.subr.bf16.mxu1 %v888_v0 }
 0x12a   :  { %694 = vmatpush3.bf16.msra.mxu1 %v746_v36 }
 0x12b   :  { %695 = vmatprep.subr.bf16.mxu1 %v888_v0 }
 0x12e   :  { %696 = vmatpush3.bf16.msra.mxu1 %v747_v37 }
 0x12f   :  { %697 = vmatprep.subr.bf16.mxu1 %v888_v0 }
 0x132   :  { %698 = vmatpush3.bf16.msra.mxu1 %v748_v38 }
 0x133   :  { %699 = vmatprep.subr.bf16.mxu1 %v888_v0 }
 0x136   :  { %700 = vmatpush3.bf16.msra.mxu1 %v749_v39 }
 0x137   :  { %701 = vmatprep.subr.bf16.mxu1 %v888_v0 }
 0x13a   :  { %702 = vmatpush3.bf16.msra.mxu1 %v750_v40 }
 0x13b   :  { %703 = vmatprep.subr.bf16.mxu1 %v888_v0 }
 0x13e   :  { %704 = vmatpush3.bf16.msra.mxu1 %v751_v49 }
 0x13f   :  { %705 = vmatprep.subr.bf16.mxu1 %v888_v0 }
 0x142   :  { %706 = vmatpush3.bf16.msra.mxu1 %v752_v50 }
 0x1e5   :  { %v309_v42 = vpop.f32.mrf.mxu1 }
 0x1e6   :  { %v310_v43 = vadd.f32 %v568_v41, %v309_v42 }
 0x1e7   :  { %v669_v44 = vpop.f32.mrf.mxu1 }
 0x1e8   :  { %v315_v45 = vmax.f32 %v310_v43, 0.0 }
 0x1e9   :  { %v312_v46 = vpop.f32.mrf.mxu1 }
 0x1ea   :  { %v318_v47 = vpack.c.bf16 %v315_v45, %v315_v45 }
 0x1eb   :  { %v670_v48 = vpop.f32.mrf.mxu1 }
 0x1ec   :  { %688 = vmatmul.mubr.bf16.vlgmr.msra.gmra.mxu0 %v318_v47 }
 0x2ac   :  { %v422_v52 = vpop.f32.mrf.mxu0 }
 0x2ad   :  { %v423_v53 = vadd.f32 %v577_v51, %v422_v52 }
 0x2ae   :  { %v689_v54 = vpop.f32.mrf.mxu0 }
 0x2af   :  { %v428_v55 = vmax.f32 %v423_v53, 0.0 }
 0x2b0   :  { %v425_v56 = vpop.f32.mrf.mxu0 }
 0x2b1   :  { %v431_v57 = vpack.c.bf16 %v428_v55, %v428_v55 }
 0x2b2   :  { %v690_v58 = vpop.f32.mrf.mxu0 }
 0x2b3   :  { %708 = vmatmul.mubr.bf16.vlgmr.msra.gmra.mxu1 %v431_v57 }
 0x373   :  { %v535_v60 = vpop.f32.mrf.mxu1 }
 0x374   :  { %v536_v61 = vadd.f32 %v586_v59, %v535_v60 }
 0x375   :  { %v709_v62 = vpop.f32.mrf.mxu1 }
 0x376   :  { %541 = vst [vmem:[#allocation12] sm:$0xff] %v536_v61 }
 0x377   :  { %v538_v63 = vpop.f32.mrf.mxu1 }
 0x378   :  { %864 = shalt.err (!%p861_p1)
}
 0x379   :  { %551 = dma.vmem_to_hbm [thread:$0]  %s549_s28, 128, %s1014_s6, [#allocation5]   ;;  %v710_v0 = vpop.f32.mrf.mxu1 }
 0x37a   :  { %879 = dma.done.wait [#allocation5], 128  }
 0x37b   :  { %880 = vsyncadd [#allocation5], 4294967168 }
 0x37c   :  { %555 = vsyncpa [#allocation4], 1 }
 0x37d   :  { %556 = vsyncpa [#allocation7], 1 }
 0x37e   :  { %557 = vsyncpa [#allocation10], 1 }
 0x37f   :  { %558 = vsyncpa [#allocation5], 1 }

</bundles_post_ra>
